<compile_context>
chip_gen: v7x
topology: tpu7x:2x2x1
jax: 0.10.0
libtpu: 0.0.40
codegen_flags: <defaults>
</compile_context>

<pallas_src>
import functools

import jax
import jax.numpy as jnp
from jax import lax
from jax.experimental import pallas as pl
from jax.experimental.pallas import tpu as pltpu


def _round_up(x, m):
    return ((x + m - 1) // m) * m


def _round_down(x, m):
    return (x // m) * m


def _cdiv(a, b):
    return -(-a // b)


def _iou_kernel(yp_ref, yt_ref, out_ref, prod_acc, plus_acc, *,
                factor, eps, hw_valid, mask_cols):
    k = pl.program_id(1)

    @pl.when(k == 0)
    def _():
        prod_acc[...] = jnp.zeros_like(prod_acc)
        plus_acc[...] = jnp.zeros_like(plus_acc)

    yp = yp_ref[...].astype(jnp.float32)   # (row_tile, thw)
    yt = yt_ref[...].astype(jnp.float32)

    if mask_cols:
        # Spatial extent is not a multiple of the tile width: zero out the
        # out-of-range lanes (their VMEM contents are unspecified).  This is
        # only traced when actually needed, and the handful of extra VPU ops
        # stay well under the HBM roofline.
        thw = yp_ref.shape[-1]
        col = lax.broadcasted_iota(jnp.int32, (1, thw), 1) + k * thw
        valid = col < hw_valid
        yp = jnp.where(valid, yp, 0.0)
        yt = jnp.where(valid, yt, 0.0)

    # One VPU mul + add per element; the cross-lane reduce per tile goes to
    # the XLU and is amortized over a multi-MiB tile, so the vector-load /
    # HBM path stays the saturating resource.
    prod_acc[...] += jnp.sum(yt * yp, axis=-1, keepdims=True)
    plus_acc[...] += jnp.sum(yt + yp, axis=-1, keepdims=True)

    @pl.when(k == pl.num_programs(1) - 1)
    def _():
        prod = prod_acc[...]
        plus = plus_acc[...]
        iou = (2.0 + factor) * prod / (plus + factor * prod + eps)
        out_ref[...] = iou.astype(out_ref.dtype)


def iou_pallas(y_pred, y_true, mode="iou", eps=0.0, *,
               vmem_input_budget_bytes=16 * 1024 * 1024):
    """y_pred, y_true: [B, C, H, W] (NCHW, axis=1). Returns [B, C] float32."""
    assert y_pred.shape == y_true.shape
    assert mode in ("iou", "dice")
    factor = {"iou": -1.0, "dice": 0.0}[mode]
    # TODO(synk): only the NCHW / axis=1 case of the generic PyTorch module is
    # implemented here.

    B, C, H, W = y_pred.shape
    R, HW = B * C, H * W
    yp = y_pred.reshape(R, HW)   # collapse of contiguous dims: no HBM copy
    yt = y_true.reshape(R, HW)

    # --- Tile sizing: biggest double-buffered input footprint under budget ---
    in_bytes = yp.dtype.itemsize + yt.dtype.itemsize   # both inputs, per element
    max_tile_elems = max(8 * 128, vmem_input_budget_bytes // (2 * in_bytes))

    # Spatial tile: as lane-wide as the budget allows for an 8-row strip.
    HW_128 = _round_up(HW, 128)
    thw_cap = max(128, _round_down(max_tile_elems // 8, 128))
    num_sp = _cdiv(HW_128, thw_cap)
    thw = _round_up(_cdiv(HW_128, num_sp), 128)
    grid_sp = _cdiv(HW, thw)
    mask_cols = (grid_sp * thw) != HW        # ragged spatial tail -> in-kernel mask

    # Row tile: fill the leftover budget; if a single row block would cover
    # everything, split it in two so the "parallel" row axis can be sharded
    # across v7x's two TensorCores.
    R_8 = _round_up(R, 8)
    row_cap = max(8, _round_down(max_tile_elems // thw, 8))
    row_tile = min(R_8, row_cap)
    if row_tile >= R_8 and R_8 >= 16:
        row_tile = _round_up(_cdiv(R_8, 2), 8)
    grid_r = _cdiv(R, row_tile)

    grid = (grid_r, grid_sp)
    kernel = functools.partial(_iou_kernel, factor=factor, eps=float(eps),
                               hw_valid=HW, mask_cols=mask_cols)

    out = pl.pallas_call(
        kernel,
        out_shape=jax.ShapeDtypeStruct((R, 1), jnp.float32),
        grid_spec=pltpu.PrefetchScalarGridSpec(
            num_scalar_prefetch=0,
            grid=grid,
            in_specs=[
                pl.BlockSpec((row_tile, thw), lambda r, k: (r, k)),
                pl.BlockSpec((row_tile, thw), lambda r, k: (r, k)),
            ],
            out_specs=pl.BlockSpec((row_tile, 1), lambda r, k: (r, 0)),
            scratch_shapes=[
                pltpu.VMEM((row_tile, 1), jnp.float32),
                pltpu.VMEM((row_tile, 1), jnp.float32),
            ],
        ),
        compiler_params=pltpu.CompilerParams(
            dimension_semantics=("parallel", "arbitrary"),
            vmem_limit_bytes=32 * 1024 * 1024,
        ),
    )(yp, yt)

    return out[:, 0].reshape(B, C)


def iou_reference(y_pred, y_true, mode="iou", eps=0.0):
    factor = {"iou": -1.0, "dice": 0.0}[mode]
    yp = y_pred.astype(jnp.float32)
    yt = y_true.astype(jnp.float32)
    prod = jnp.sum(yt * yp, axis=(2, 3))
    plus = jnp.sum(yt + yp, axis=(2, 3))
    return (2.0 + factor) * prod / (plus + factor * prod + eps)


if __name__ == "__main__":
    key = jax.random.PRNGKey(0)
    k1, k2, k3, k4 = jax.random.split(key, 4)

    # Case 1: aligned small shape (typical NCHW input) -- no masking path.
    B, C, H, W = 2, 4, 16, 16
    y_pred = jax.nn.sigmoid(jax.random.normal(k1, (B, C, H, W), dtype=jnp.float32))
    y_true = (jax.random.uniform(k2, (B, C, H, W)) > 0.5).astype(jnp.float32)

    out = jax.block_until_ready(iou_pallas(y_pred, y_true, mode="iou", eps=0.0))
    ref = iou_reference(y_pred, y_true, mode="iou", eps=0.0)
    assert out.shape == (B, C)
    assert jnp.allclose(out, ref, atol=1e-5, rtol=1e-5), (out, ref)

    # Also exercise mode='dice' (factor = 0.0).
    out_d = jax.block_until_ready(iou_pallas(y_pred, y_true, mode="dice", eps=0.0))
    ref_d = iou_reference(y_pred, y_true, mode="dice", eps=0.0)
    assert jnp.allclose(out_d, ref_d, atol=1e-5, rtol=1e-5), (out_d, ref_d)

    # Case 2: unaligned shape -> ragged row block + in-kernel spatial mask.
    B2, C2, H2, W2 = 2, 3, 15, 13
    yp2 = jax.nn.sigmoid(jax.random.normal(k3, (B2, C2, H2, W2), dtype=jnp.float32))
    yt2 = (jax.random.uniform(k4, (B2, C2, H2, W2)) > 0.5).astype(jnp.float32)

    out2 = jax.block_until_ready(iou_pallas(yp2, yt2, mode="iou", eps=0.0))
    ref2 = iou_reference(yp2, yt2, mode="iou", eps=0.0)
    assert out2.shape == (B2, C2)
    assert jnp.allclose(out2, ref2, atol=1e-5, rtol=1e-5), (out2, ref2)

    print("KERNEL_OK")
</pallas_src>

<mosaic_0001>
module attributes {stable_mosaic.version = 11 : i64} {
  func.func @_iou_kernel(%arg0: i32, %arg1: i32, %arg2: memref<8x256xf32, #tpu.memory_space<vmem>>, %arg3: memref<8x256xf32, #tpu.memory_space<vmem>>, %arg4: memref<8x1xf32, #tpu.memory_space<vmem>>, %arg5: memref<8x1xf32, #tpu.memory_space<vmem>>, %arg6: memref<8x1xf32, #tpu.memory_space<vmem>>) attributes {dimension_semantics = [#tpu.dimension_semantics<parallel>, #tpu.dimension_semantics<arbitrary>], iteration_bounds = array<i64: 1, 1>, scalar_prefetch = 0 : i64, scratch_operands = 2 : i64, tpu.core_type = #tpu.core_type<tc>, window_params = [{transform_indices = @transform_0, window_bounds = array<i64: 8, 256>}, {transform_indices = @transform_1, window_bounds = array<i64: 8, 256>}, {transform_indices = @transform_2, window_bounds = array<i64: 8, 1>}]} {
    %c0_i32 = arith.constant 0 : i32
    %0 = arith.cmpi eq, %arg1, %c0_i32 : i32
    %1 = arith.extui %0 : i1 to i32
    %c0_i32_0 = arith.constant 0 : i32
    %2 = arith.cmpi ne, %1, %c0_i32_0 : i32
    scf.if %2 {
      %cst_15 = arith.constant 0.000000e+00 : f32
      %20 = vector.broadcast %cst_15 : f32 to vector<8x1xf32>
      %c0_16 = arith.constant 0 : index
      %c0_17 = arith.constant 0 : index
      %21 = vector.load %arg5[%c0_16, %c0_17] : memref<8x1xf32, #tpu.memory_space<vmem>>, vector<8x1xf32>
      tpu.vector_store %arg5[%c0_16, %c0_17], %20 {strides = array<i32>} : memref<8x1xf32, #tpu.memory_space<vmem>>, vector<8x1xf32>,
      %cst_18 = arith.constant 0.000000e+00 : f32
      %22 = vector.broadcast %cst_18 : f32 to vector<8x1xf32>
      %c0_19 = arith.constant 0 : index
      %c0_20 = arith.constant 0 : index
      %23 = vector.load %arg6[%c0_19, %c0_20] : memref<8x1xf32, #tpu.memory_space<vmem>>, vector<8x1xf32>
      tpu.vector_store %arg6[%c0_19, %c0_20], %22 {strides = array<i32>} : memref<8x1xf32, #tpu.memory_space<vmem>>, vector<8x1xf32>,
    } else {
    }
    %c0 = arith.constant 0 : index
    %c0_1 = arith.constant 0 : index
    %3 = vector.load %arg2[%c0, %c0_1] : memref<8x256xf32, #tpu.memory_space<vmem>>, vector<8x256xf32>
    %c0_2 = arith.constant 0 : index
    %c0_3 = arith.constant 0 : index
    %4 = vector.load %arg3[%c0_2, %c0_3] : memref<8x256xf32, #tpu.memory_space<vmem>>, vector<8x256xf32>
    %c0_4 = arith.constant 0 : index
    %c0_5 = arith.constant 0 : index
    %5 = vector.load %arg5[%c0_4, %c0_5] : memref<8x1xf32, #tpu.memory_space<vmem>>, vector<8x1xf32>
    %6 = arith.mulf %4, %3 : vector<8x256xf32>
    %cst = arith.constant dense<0.000000e+00> : vector<8xf32>
    %7 = vector.multi_reduction <add>, %6, %cst [1] : vector<8x256xf32> to vector<8xf32>
    %8 = vector.shape_cast %7 : vector<8xf32> to vector<8x1xf32>
    %9 = arith.addf %5, %8 : vector<8x1xf32>
    %c0_6 = arith.constant 0 : index
    %c0_7 = arith.constant 0 : index
    %10 = vector.load %arg5[%c0_6, %c0_7] : memref<8x1xf32, #tpu.memory_space<vmem>>, vector<8x1xf32>
    tpu.vector_store %arg5[%c0_6, %c0_7], %9 {strides = array<i32>} : memref<8x1xf32, #tpu.memory_space<vmem>>, vector<8x1xf32>,
    %c0_8 = arith.constant 0 : index
    %c0_9 = arith.constant 0 : index
    %11 = vector.load %arg6[%c0_8, %c0_9] : memref<8x1xf32, #tpu.memory_space<vmem>>, vector<8x1xf32>
    %12 = arith.addf %4, %3 : vector<8x256xf32>
    %cst_10 = arith.constant dense<0.000000e+00> : vector<8xf32>
    %13 = vector.multi_reduction <add>, %12, %cst_10 [1] : vector<8x256xf32> to vector<8xf32>
    %14 = vector.shape_cast %13 : vector<8xf32> to vector<8x1xf32>
    %15 = arith.addf %11, %14 : vector<8x1xf32>
    %c0_11 = arith.constant 0 : index
    %c0_12 = arith.constant 0 : index
    %16 = vector.load %arg6[%c0_11, %c0_12] : memref<8x1xf32, #tpu.memory_space<vmem>>, vector<8x1xf32>
    tpu.vector_store %arg6[%c0_11, %c0_12], %15 {strides = array<i32>} : memref<8x1xf32, #tpu.memory_space<vmem>>, vector<8x1xf32>,
    %c0_i32_13 = arith.constant 0 : i32
    %17 = arith.cmpi eq, %arg1, %c0_i32_13 : i32
    %18 = arith.extui %17 : i1 to i32
    %c0_i32_14 = arith.constant 0 : i32
    %19 = arith.cmpi ne, %18, %c0_i32_14 : i32
    scf.if %19 {
      %c0_15 = arith.constant 0 : index
      %c0_16 = arith.constant 0 : index
      %20 = vector.load %arg5[%c0_15, %c0_16] : memref<8x1xf32, #tpu.memory_space<vmem>>, vector<8x1xf32>
      %c0_17 = arith.constant 0 : index
      %c0_18 = arith.constant 0 : index
      %21 = vector.load %arg6[%c0_17, %c0_18] : memref<8x1xf32, #tpu.memory_space<vmem>>, vector<8x1xf32>
      %cst_19 = arith.constant 1.000000e+00 : f32
      %22 = vector.broadcast %cst_19 : f32 to vector<8x1xf32>
      %23 = arith.mulf %22, %20 : vector<8x1xf32>
      %cst_20 = arith.constant -1.000000e+00 : f32
      %24 = vector.broadcast %cst_20 : f32 to vector<8x1xf32>
      %25 = arith.mulf %24, %20 : vector<8x1xf32>
      %26 = arith.addf %21, %25 : vector<8x1xf32>
      %cst_21 = arith.constant 0.000000e+00 : f32
      %27 = vector.broadcast %cst_21 : f32 to vector<8x1xf32>
      %28 = arith.addf %26, %27 : vector<8x1xf32>
      %29 = arith.divf %23, %28 : vector<8x1xf32>
      %c0_22 = arith.constant 0 : index
      %c0_23 = arith.constant 0 : index
      %30 = vector.load %arg4[%c0_22, %c0_23] : memref<8x1xf32, #tpu.memory_space<vmem>>, vector<8x1xf32>
      tpu.vector_store %arg4[%c0_22, %c0_23], %29 {strides = array<i32>} : memref<8x1xf32, #tpu.memory_space<vmem>>, vector<8x1xf32>,
    } else {
    }
    return
  }
  func.func @transform_0(%arg0: i32, %arg1: i32) -> (i32, i32) {
    %c0_i32 = arith.constant 0 : i32
    return %arg0, %arg1 : i32, i32
  }
  func.func @transform_1(%arg0: i32, %arg1: i32) -> (i32, i32) {
    %c0_i32 = arith.constant 0 : i32
    return %arg0, %arg1 : i32, i32
  }
  func.func @transform_2(%arg0: i32, %arg1: i32) -> (i32, i32) {
    %c0_i32 = arith.constant 0 : i32
    %c0_i32_0 = arith.constant 0 : i32
    return %arg0, %c0_i32 : i32, i32
  }
}

</mosaic_0001>

<bundles_post_ra>
// kernel: tpu_custom_call.1
= control target key start
LH: loop header
LB: loop body
LE: loop exit
PB: predicated region body
PF: predicated region fallthrough
CT: control target
= control target key end

     0   :  { %7 = vsyncpa [#allocation5], 0  ;;  %s183_s0 = inlined_call_operand.hbm [shape: f32[8,256], index: 0, kind: input, shape index: {}]   ;;  %s184_s1 = inlined_call_operand.hbm [shape: f32[8,256], index: 1, kind: input, shape index: {}]   ;;  %s185_s2 = inlined_call_operand.vmem [shape: f32[8,1], index: 2, kind: output, shape index: {}]  }
   0x1   :  { %8 = vsyncpa [#allocation7], 0  ;;  %s133_s9 = smov [#allocation4]   ;;  %s134_s11 = smov [#allocation6]  }
   0x2   :  { %s15_s10 = sshll.u32 %s133_s9, 4  ;;  %s25_s12 = sshll.u32 %s134_s11, 4  ;;  %s16_s10 = int_to_ptr.vmem [resolvable:$true] %s15_s10  ;;  %s26_s12 = int_to_ptr.vmem [resolvable:$true] %s25_s12 }
   0x3   :  { %s85_s15 = scalar_lea.hbm %s183_s0, 256 }
   0x4   :  { %p86_p0 = scmp.ne.s32.totalorder %s183_s0, %s85_s15  ;;  %p89_p1 = scmp.lt.u32.totalorder %s85_s15, %s183_s0 }
   0x6   :  { %p91_p2 = pnand %p89_p1, %p86_p0 }
   0x8   :  { %94 = shalt.err (!%p91_p2)
}
   0x9   :  { %s95_s20 = scalar_lea.vmem %s16_s10, 256  ;;  %p100_p4 = scmp.lt.s32.totalorder %s16_s10, %s16_s10 }
   0xa   :  { %p96_p3 = scmp.ne.s32.totalorder %s16_s10, %s95_s20  ;;  %p101_p5 = scmp.lt.s32.totalorder %s95_s20, %s95_s20 }
   0xc   :  { %p102_p6 = por %p101_p5, %p100_p4 }
   0xe   :  { %p103_p7 = pnand %p102_p6, %p96_p3 }
  0x10   :  { %106 = shalt.err (!%p103_p7)
}
  0x11   :  { %18 = dma.hbm_to_vmem [thread:$0]  %s183_s0, 256, %s16_s10, [#allocation5]  }
  0x12   :  { %s107_s25 = scalar_lea.hbm %s184_s1, 256 }
  0x13   :  { %p108_p8 = scmp.ne.s32.totalorder %s184_s1, %s107_s25  ;;  %p111_p9 = scmp.lt.u32.totalorder %s107_s25, %s184_s1 }
  0x15   :  { %p113_p10 = pnand %p111_p9, %p108_p8 }
  0x17   :  { %116 = shalt.err (!%p113_p10)
}
  0x18   :  { %s117_s30 = scalar_lea.vmem %s26_s12, 256  ;;  %p122_p12 = scmp.lt.s32.totalorder %s26_s12, %s26_s12 }
  0x19   :  { %p118_p11 = scmp.ne.s32.totalorder %s26_s12, %s117_s30  ;;  %p123_p13 = scmp.lt.s32.totalorder %s117_s30, %s117_s30 }
  0x1b   :  { %p124_p0 = por %p123_p13, %p122_p12 }
  0x1d   :  { %p125_p1 = pnand %p124_p0, %p118_p11 }
  0x1f   :  { %128 = shalt.err (!%p125_p1)
}
  0x20   :  { %28 = dma.hbm_to_vmem [thread:$0]  %s184_s1, 256, %s26_s12, [#allocation7]  }
  0x21   :  { %129 = dma.done.wait [#allocation5], 256  }
  0x22   :  { %130 = vsyncadd [#allocation5], 4294967040 }
  0x23   :  { %131 = dma.done.wait [#allocation7], 256  }
  0x24   :  { %132 = vsyncadd [#allocation7], 4294967040  ;;  %vm39_vm0 = vcmask 7168   ;;  %v135_v0 = vmov 0.0   ;;  %v42_v1 = vld [vmem:[#allocation4] sm:$0xff]  ;;  %v43_v2 = vld [vmem:[#allocation4 + $0x8] sm:$0xff] }
  0x25   :  { %40 = vst.msk [vmem:[#allocation2] sm:$0xff] %vm39_vm0, %v135_v0  ;;  %41 = vst.msk [vmem:[#allocation3] sm:$0xff] %vm39_vm0, %v135_v0  ;;  %v44_v3 = vld [vmem:[#allocation6] sm:$0xff]  ;;  %v45_v4 = vld [vmem:[#allocation6 + $0x8] sm:$0xff] }
  0x26   :  { %v47_v5 = vmul.f32 %v44_v3, %v42_v1  ;;  %v48_v6 = vmul.f32 %v45_v4, %v43_v2  ;;  %v56_v7 = vadd.f32 %v44_v3, %v42_v1  ;;  %v57_v8 = vadd.f32 %v45_v4, %v43_v2 }
  0x28   :  { %v49_v9 = vadd.f32 %v48_v6, %v47_v5  ;;  %v58_v10 = vadd.f32 %v57_v8, %v56_v7 }
  0x2a   :  { %50 = vadd.xlane.f32.xlu0 %v49_v9 }
  0x2c   :  { %v46_v11 = vld [vmem:[#allocation2] sm:$0xff]  ;;  %v55_v14 = vld [vmem:[#allocation3] sm:$0xff] }
  0x2e   :  { %59 = vadd.xlane.f32.xlu0 %v58_v10 }
  0xb7   :  { %v51_v12 = vpop.xlane.xlu0 %50 }
  0xb8   :  { %v52_v13 = vadd.f32 %v51_v12, %v46_v11 }
  0xba   :  { %54 = vst.msk [vmem:[#allocation2] sm:$0xff] %vm39_vm0, %v52_v13 }
  0xbb   :  { %v60_v15 = vpop.xlane.xlu0 %59 }
  0xbc   :  { %v61_v16 = vadd.f32 %v60_v15, %v55_v14 }
  0xbe   :  { %62 = vst.msk [vmem:[#allocation3] sm:$0xff] %vm39_vm0, %v61_v16 }
  0xc1   :  { %v66_v17 = vld [vmem:[#allocation2] sm:$0xff] }
  0xc2   :  { %v68_v18 = vmul.f32 -1.0, %v66_v17 }
  0xc5   :  { %v67_v19 = vld [vmem:[#allocation3] sm:$0xff] }
  0xc6   :  { %v69_v20 = vadd.f32 %v68_v18, %v67_v19 }
  0xc8   :  { %83 = vrcp.f32 %v69_v20 }
  0xd2   :  { %v84_v21 = vpop.eup %83 }
  0xd3   :  { %v72_v22 = vmul.f32 %v84_v21, %v66_v17 }
  0xd5   :  { %73 = vst.msk [vmem:[%s185_s2] sm:$0xff] %vm39_vm0, %v72_v22 }
  0xd6   :  { %78 = vsyncpa [#allocation5], 1 }
  0xd7   :  { %79 = vsyncpa [#allocation7], 1 }

</bundles_post_ra>
